<compile_context>
chip_gen: v6e
topology: v6e:2x2x1
jax: 0.10.0
libtpu: 0.0.40
codegen_flags: <defaults>
</compile_context>

<pallas_src>
import functools

import jax
import jax.numpy as jnp
import numpy as np
from jax.experimental import pallas as pl
from jax.experimental.pallas import tpu as pltpu


def _round_up(x, m):
    return ((x + m - 1) // m) * m


# ---------------------------------------------------------------------------
# Kernel A: batched Chebyshev recursion (one batch-block per grid step).
#   x_ref:   (1, N, W)      f32,  W = B_blk*C, lane index = b*C + c
#   lap_ref: (N, N)         mxu_dtype (constant index_map -> resident)
#   o_ref:   (k-1, N, W)    cp_dtype (components T_1..T_{k-1}; T_0 == ones is
#                            folded into the projection bias)
# ---------------------------------------------------------------------------
def _cheby_kernel(x_ref, lap_ref, o_ref, *, k, mxu_dtype, cp_dtype):
    x = x_ref[0]            # (N, W) f32
    lap = lap_ref[...]      # (N, N) mxu_dtype

    def lap_mm(t):          # MXU matmul in mxu_dtype, f32 accumulation
        return jnp.dot(lap, t.astype(mxu_dtype),
                       preferred_element_type=jnp.float32)

    def store(idx, val):    # write each component as soon as it is produced
        o_ref[idx] = val.astype(cp_dtype)

    if k == 2:
        store(0, lap_mm(x))                 # torch comp1 = lap @ x
    else:
        t_prev = x                          # torch comp1 = x
        t_cur = lap_mm(x)                   # torch comp2 = lap @ x
        store(0, t_prev)
        store(1, t_cur)
        for idx in range(2, k - 1):         # T_j = 2*lap@T_{j-1} - T_{j-2} (f32)
            t_prev, t_cur = t_cur, 2.0 * lap_mm(t_cur) - t_prev
            store(idx, t_cur)


# ---------------------------------------------------------------------------
# Kernel B: tiled projection GEMM (+ the ones-component bias).
#   cp_ref: (TR, (k-1)*C)  mxu_dtype   row-stacked Chebyshev features
#   w_ref:  ((k-1)*C, OUT_P) mxu_dtype
#   b_ref:  (1, OUT_P)     f32
#   o_ref:  (TR, OUT_P)    f32         OUT_P is a 128-multiple -> unmasked vst
# ---------------------------------------------------------------------------
def _project_kernel(cp_ref, w_ref, b_ref, o_ref):
    o_ref[...] = (jnp.dot(cp_ref[...], w_ref[...],
                          preferred_element_type=jnp.float32)
                  + b_ref[...])


def graph_conv(x, lap, weight, *, k, block_b=None, lane_target=256,
               mxu_dtype=jnp.bfloat16):
    """Pallas GraphConv forward.

    x:      (B, N, C) float32   (batch, ele_channel/nodes, in_channels)
    lap:    (N, N)    float32   shared Laplacian
    weight: (k*C, out) float32  PyTorch row order (c*k + j)
    returns (B, N, out) float32
    """
    B, N, C = x.shape
    out_ch = weight.shape[1]
    assert weight.shape[0] == k * C

    x = x.astype(jnp.float32)
    weight = weight.astype(jnp.float32)

    # --- weight plumbing: torch row index is c*k + j -------------------------
    w3 = weight.reshape(C, k, out_ch)               # w3[c, j, :] = weight[c*k+j]
    bias = jnp.sum(w3[:, 0, :], axis=0)             # ones-component folded in

    if k == 1:
        # Degenerate case: output is input-independent (ones @ weight).
        return jnp.broadcast_to(bias[None, None, :],
                                (B, N, out_ch)).astype(jnp.float32)

    out_p = _round_up(out_ch, 128)                  # lane-dense output stores
    w_proj = jnp.transpose(w3[:, 1:, :], (1, 0, 2)).reshape((k - 1) * C, out_ch)
    w_proj = jnp.pad(w_proj, ((0, 0), (0, out_p - out_ch))).astype(mxu_dtype)
    bias_p = jnp.pad(bias, (0, out_p - out_ch)).astype(jnp.float32).reshape(1, out_p)

    # --- batch blocking: pack B_blk batch elements into the lane dimension ---
    if block_b is None:
        block_b = max(1, min(B, lane_target // max(C, 1)))
        # v7x has 2 TensorCores: prefer >=2 "parallel" grid steps when the
        # per-step matmul RHS stays at least 128 lanes wide.
        if ((B + block_b - 1) // block_b < 2 and block_b > 1
                and (block_b // 2) * C >= 128):
            block_b = (block_b + 1) // 2
    grid_b = (B + block_b - 1) // block_b
    b_pad = grid_b * block_b
    if b_pad != B:
        x = jnp.pad(x, ((0, b_pad - B), (0, 0), (0, 0)))

    w_lanes = block_b * C
    # (G, N, B_blk*C), lane index b*C + c  (layout plumbing, outside the kernel)
    x_blk = x.reshape(grid_b, block_b, N, C).transpose(0, 2, 1, 3).reshape(
        grid_b, N, w_lanes)
    lap_m = lap.astype(mxu_dtype)                   # bf16 lap: half the VMEM/HBM
    mxu_bytes = jnp.dtype(mxu_dtype).itemsize

    # ---- stage 1: Chebyshev recursion ---------------------------------------
    n_lap_mm = k - 2 if k >= 3 else 1
    cheb_flops = 2 * N * N * w_lanes * n_lap_mm * grid_b
    cheb_bytes = (x_blk.size * 4 + lap_m.size * mxu_bytes
                  + grid_b * (k - 1) * N * w_lanes * mxu_bytes)
    vmem_a = (2 * N * w_lanes * 4                       # x block (double buffered)
              + 2 * N * N * mxu_bytes                   # lap (budget x2)
              + 2 * (k - 1) * N * w_lanes * mxu_bytes   # cp block (double buffered)
              + 4 * N * w_lanes * 4)                    # live recursion terms
    # TODO(synk): for very large N on v7x (64 MiB VMEM), add a contraction grid
    # axis that tiles lap columns instead of keeping the full (N, N) resident.
    cp = pl.pallas_call(
        functools.partial(_cheby_kernel, k=k, mxu_dtype=mxu_dtype,
                          cp_dtype=mxu_dtype),
        out_shape=jax.ShapeDtypeStruct((grid_b * (k - 1), N, w_lanes), mxu_dtype),
        grid_spec=pltpu.PrefetchScalarGridSpec(
            num_scalar_prefetch=0,
            grid=(grid_b,),
            in_specs=[
                pl.BlockSpec((1, N, w_lanes), lambda g: (g, 0, 0)),   # x block
                pl.BlockSpec((N, N), lambda g: (0, 0)),               # lap
            ],
            out_specs=pl.BlockSpec((k - 1, N, w_lanes), lambda g: (g, 0, 0)),
        ),
        compiler_params=pltpu.CompilerParams(
            dimension_semantics=("parallel",),
            vmem_limit_bytes=int(min(max(2 * vmem_a, 32 << 20), 64 << 20)),
        ),
        cost_estimate=pl.CostEstimate(flops=int(cheb_flops), transcendentals=0,
                                      bytes_accessed=int(cheb_bytes)),
    )(x_blk, lap_m)

    # ---- layout plumbing: (G*(k-1), N, B_blk*C) -> (B_pad*N, (k-1)*C) -------
    kc = (k - 1) * C
    cp_rows = cp.reshape(grid_b, k - 1, N, block_b, C).transpose(
        0, 3, 2, 1, 4).reshape(b_pad * N, kc)

    # ---- stage 2: projection GEMM + bias ------------------------------------
    rows = b_pad * N
    tile_r = min(512, _round_up(rows, 8))
    rows_pad = _round_up(rows, tile_r)
    if rows_pad != rows:
        cp_rows = jnp.pad(cp_rows, ((0, rows_pad - rows), (0, 0)))
    grid_r = rows_pad // tile_r

    proj_flops = 2 * rows_pad * kc * out_p
    proj_bytes = (cp_rows.size * mxu_bytes + w_proj.size * mxu_bytes
                  + bias_p.size * 4 + rows_pad * out_p * 4)
    vmem_b = (2 * tile_r * kc * mxu_bytes + 2 * kc * out_p * mxu_bytes
              + 2 * out_p * 4 + 2 * tile_r * out_p * 4)
    out_rows = pl.pallas_call(
        _project_kernel,
        out_shape=jax.ShapeDtypeStruct((rows_pad, out_p), jnp.float32),
        grid_spec=pltpu.PrefetchScalarGridSpec(
            num_scalar_prefetch=0,
            grid=(grid_r,),
            in_specs=[
                pl.BlockSpec((tile_r, kc), lambda r: (r, 0)),     # cp row tile
                pl.BlockSpec((kc, out_p), lambda r: (0, 0)),      # weight
                pl.BlockSpec((1, out_p), lambda r: (0, 0)),       # bias
            ],
            out_specs=pl.BlockSpec((tile_r, out_p), lambda r: (r, 0)),
        ),
        compiler_params=pltpu.CompilerParams(
            dimension_semantics=("parallel",),
            vmem_limit_bytes=int(min(max(2 * vmem_b, 32 << 20), 64 << 20)),
        ),
        cost_estimate=pl.CostEstimate(flops=int(proj_flops), transcendentals=0,
                                      bytes_accessed=int(proj_bytes)),
    )(cp_rows, w_proj, bias_p)

    out = out_rows[:rows, :out_ch].reshape(b_pad, N, out_ch)[:B]
    return out


def _reference(x, lap, weight, k):
    """Pure-JAX (f32) re-implementation of the PyTorch forward (verification)."""
    B, N, C = x.shape
    t0 = jnp.ones((B, N, C), jnp.float32)
    if k == 1:
        comps = [t0]
    elif k == 2:
        comps = [t0, jnp.einsum('nm,bmc->bnc', lap, x)]
    else:
        tkm1 = x
        tk = jnp.einsum('nm,bmc->bnc', lap, x)
        comps = [t0, tkm1, tk]
        for _ in range(3, k):
            tkm2, tkm1 = tkm1, tk
            tk = 2.0 * jnp.einsum('nm,bmc->bnc', lap, tkm1) - tkm2
            comps.append(tk)
    cp = jnp.stack(comps, axis=1)                 # (B, k, N, C)
    cp = jnp.transpose(cp, (0, 2, 3, 1))          # (B, N, C, k)
    cp = cp.reshape(B, N, C * k)                  # flatten (c, j) -> c*k + j
    return cp @ weight


if __name__ == "__main__":
    # Small, deterministic example shapes.
    B, N, C, OUT, K = 2, 16, 4, 8, 3

    key = jax.random.PRNGKey(0)
    kx, klap, kw = jax.random.split(key, 3)

    x = jax.random.normal(kx, (B, N, C), dtype=jnp.float32)
    # Symmetric "Laplacian-like" matrix, shared across the batch.
    a = jax.random.normal(klap, (N, N), dtype=jnp.float32)
    lap = 0.5 * (a + a.T) / jnp.sqrt(float(N))

    # Xavier-uniform init for weight of shape (k * in_channels, out_channels).
    fan_in, fan_out = K * C, OUT
    bound = float(np.sqrt(6.0 / (fan_in + fan_out)))
    weight = jax.random.uniform(kw, (K * C, OUT), dtype=jnp.float32,
                                minval=-bound, maxval=bound)

    out = graph_conv(x, lap, weight, k=K)
    out = jax.block_until_ready(out)
    assert out.shape == (B, N, OUT)

    ref = _reference(x, lap, weight, K)
    # bf16 MXU operands with f32 accumulation -> tolerance sized for bf16
    # rounding; any structural/indexing bug would produce O(1) errors.
    np.testing.assert_allclose(np.asarray(out), np.asarray(ref),
                               rtol=5e-2, atol=5e-2)

    print("KERNEL_OK")
</pallas_src>

<mosaic_0001>
module attributes {stable_mosaic.version = 11 : i64} {
  func.func @_cheby_kernel(%arg0: i32, %arg1: memref<1x16x8xf32, #tpu.memory_space<vmem>>, %arg2: memref<16x16xbf16, #tpu.memory_space<vmem>>, %arg3: memref<2x16x8xbf16, #tpu.memory_space<vmem>>) attributes {dimension_semantics = [#tpu.dimension_semantics<parallel>], iteration_bounds = array<i64: 1>, scalar_prefetch = 0 : i64, scratch_operands = 0 : i64, tpu.core_type = #tpu.core_type<tc>, window_params = [{transform_indices = @transform_0, window_bounds = array<i64: 1, 16, 8>}, {pipeline_mode = #tpu.pipeline_mode<synchronous>, transform_indices = @transform_1, window_bounds = array<i64: 16, 16>}, {transform_indices = @transform_2, window_bounds = array<i64: 2, 16, 8>}]} {
    %c0 = arith.constant 0 : index
    %c0_0 = arith.constant 0 : index
    %c0_1 = arith.constant 0 : index
    %0 = vector.load %arg1[%c0, %c0_0, %c0_1] : memref<1x16x8xf32, #tpu.memory_space<vmem>>, vector<1x16x8xf32>
    %1 = vector.shape_cast %0 : vector<1x16x8xf32> to vector<16x8xf32>
    %c0_2 = arith.constant 0 : index
    %c0_3 = arith.constant 0 : index
    %2 = vector.load %arg2[%c0_2, %c0_3] : memref<16x16xbf16, #tpu.memory_space<vmem>>, vector<16x16xbf16>
    %3 = arith.truncf %1 : vector<16x8xf32> to vector<16x8xbf16>
    %cst = arith.constant dense<0.000000e+00> : vector<16x8xf32>
    %4 = tpu.matmul %2, %3, %cst {dimension_numbers = #tpu.dot_dimension_numbers<[1], [0], [0], [1], [0, 0, 1, 1], [], []>} : vector<16x16xbf16>, vector<16x8xbf16>, vector<16x8xf32> -> vector<16x8xf32>
    %5 = arith.truncf %1 : vector<16x8xf32> to vector<16x8xbf16>
    %c0_4 = arith.constant 0 : index
    %c0_5 = arith.constant 0 : index
    %c0_6 = arith.constant 0 : index
    %6 = vector.load %arg3[%c0_4, %c0_5, %c0_6] : memref<2x16x8xbf16, #tpu.memory_space<vmem>>, vector<1x16x8xbf16>
    %7 = vector.shape_cast %6 : vector<1x16x8xbf16> to vector<16x8xbf16>
    %8 = vector.shape_cast %5 : vector<16x8xbf16> to vector<1x16x8xbf16>
    tpu.vector_store %arg3[%c0_4, %c0_5, %c0_6], %8 {strides = array<i32>} : memref<2x16x8xbf16, #tpu.memory_space<vmem>>, vector<1x16x8xbf16>,
    %9 = arith.truncf %4 : vector<16x8xf32> to vector<16x8xbf16>
    %c1 = arith.constant 1 : index
    %c0_7 = arith.constant 0 : index
    %c0_8 = arith.constant 0 : index
    %10 = vector.load %arg3[%c1, %c0_7, %c0_8] : memref<2x16x8xbf16, #tpu.memory_space<vmem>>, vector<1x16x8xbf16>
    %11 = vector.shape_cast %10 : vector<1x16x8xbf16> to vector<16x8xbf16>
    %12 = vector.shape_cast %9 : vector<16x8xbf16> to vector<1x16x8xbf16>
    tpu.vector_store %arg3[%c1, %c0_7, %c0_8], %12 {strides = array<i32>} : memref<2x16x8xbf16, #tpu.memory_space<vmem>>, vector<1x16x8xbf16>,
    return
  }
  func.func @transform_0(%arg0: i32) -> (i32, i32, i32) {
    %c0_i32 = arith.constant 0 : i32
    %c0_i32_0 = arith.constant 0 : i32
    %c0_i32_1 = arith.constant 0 : i32
    return %arg0, %c0_i32, %c0_i32_0 : i32, i32, i32
  }
  func.func @transform_1(%arg0: i32) -> (i32, i32) {
    %c0_i32 = arith.constant 0 : i32
    %c0_i32_0 = arith.constant 0 : i32
    %c0_i32_1 = arith.constant 0 : i32
    return %c0_i32, %c0_i32_0 : i32, i32
  }
  func.func @transform_2(%arg0: i32) -> (i32, i32, i32) {
    %c0_i32 = arith.constant 0 : i32
    %c0_i32_0 = arith.constant 0 : i32
    %c0_i32_1 = arith.constant 0 : i32
    return %arg0, %c0_i32, %c0_i32_0 : i32, i32, i32
  }
}

</mosaic_0001>

<bundles_post_ra>
// kernel: tpu_custom_call.1
= control target key start
LH: loop header
LB: loop body
LE: loop exit
PB: predicated region body
PF: predicated region fallthrough
CT: control target
= control target key end

     0   :  { %v115_v0 = vmov 0.0   ;;  %vm116_vm0 = vmmov 0   ;;  %vm74_vm1 = vcmask 60416   ;;  %vm22_vm2 = vcmask 130048   ;;  %s153_s0 = inlined_call_operand.vmem [shape: f32[1,16,8], index: 0, kind: input, shape index: {}]   ;;  %s154_s1 = inlined_call_operand.vmem [shape: bf16[16,16], index: 1, kind: input, shape index: {}]   ;;  %s155_s2 = inlined_call_operand.vmem [shape: bf16[2,16,8], index: 2, kind: output, shape index: {}]  }
   0x1   :  { %106 = vmatprep.subr.bf16.mxu0 %v115_v0  ;;  %v12_v1 = vld [vmem:[%s153_s0] sm:$0xff]  ;;  %v13_v2 = vld [vmem:[%s153_s0 + $0x8] sm:$0xff]  ;;  %108 = vmatprep.mubr.msk.bf16.mxu0 %vm116_vm0, %v115_v0 }
   0x2   :  { %v16_v3 = vpack.c.bf16 %v13_v2, %v12_v1  ;;  %v100_v4 = vpack.c.bf16 %v12_v1, %v12_v1  ;;  %v101_v5 = vpack.c.bf16 %v13_v2, %v13_v2  ;;  %v114_v6 = vld [vmem:[%s154_s1] sm:$0xff]  }
   0x4   :  { %107 = vmatpush3.bf16.msra.mxu0 %v16_v3  ;;  %75 = vst.msk [vmem:[%s155_s2] sm:$0xf] %vm74_vm1, %v100_v4  ;;  %76 = vst.msk [vmem:[%s155_s2 + $0x4] sm:$0xf] %vm74_vm1, %v101_v5 }
   0x7   :  { %109 = vmatmul.mubr.msk.bf16.vlgmr.msra.gmra.mxu0 %vm22_vm2, %v114_v6 }
  0xc7   :  { %v60_v7 = vpop.f32.mrf.mxu0 }
  0xc8   :  { %v102_v8 = vpack.c.bf16 %v60_v7, %v60_v7 }
  0xc9   :  { %v110_v9 = vpop.f32.mrf.mxu0 }
  0xca   :  { %98 = vst.msk [vmem:[%s155_s2 + $0x8] sm:$0xf] %vm74_vm1, %v102_v8 }
  0xcb   :  { %v63_v10 = vpop.f32.mrf.mxu0 }
  0xcc   :  { %v103_v11 = vpack.c.bf16 %v63_v10, %v63_v10 }
  0xcd   :  { %v111_v12 = vpop.f32.mrf.mxu0 }
  0xce   :  { %99 = vst.msk [vmem:[%s155_s2 + $0xc] sm:$0xf] %vm74_vm1, %v103_v11 }

</bundles_post_ra>
